<compile_context>
chip_gen: v5e
topology: v5e:2x2
jax: 0.10.0
libtpu: 0.0.40
codegen_flags: <defaults>
</compile_context>

<pallas_src>
import functools
import math

import jax
import jax.numpy as jnp
from jax.experimental import pallas as pl
from jax.experimental.pallas import tpu as pltpu

F32 = jnp.float32
BF16 = jnp.bfloat16


def _row_tile(m, cap=256):
    # full array (always legal) when small, otherwise a multiple-of-8 tile
    return m if m <= cap else cap


def _col_tile(n, cap=512):
    # full array when small, otherwise a multiple-of-128 tile
    return n if n <= cap else cap


# ----------------------------- Pallas kernels --------------------------------

def _layernorm_kernel(x_ref, g_ref, b_ref, o_ref, *, eps):
    x = x_ref[...].astype(jnp.float32)
    mean = jnp.mean(x, axis=-1, keepdims=True)
    xc = x - mean
    var = jnp.mean(xc * xc, axis=-1, keepdims=True)
    o_ref[...] = xc * jax.lax.rsqrt(var + eps) * g_ref[...] + b_ref[...]


def pallas_layernorm(x, gamma2, beta2, eps=1e-7):
    """LayerNorm over last axis. x: (M, H); gamma2/beta2: (1, H)."""
    M, H = x.shape
    tm = _row_tile(M)
    return pl.pallas_call(
        functools.partial(_layernorm_kernel, eps=eps),
        out_shape=jax.ShapeDtypeStruct((M, H), F32),
        grid=(pl.cdiv(M, tm),),
        in_specs=[
            pl.BlockSpec((tm, H), lambda i: (i, 0)),
            pl.BlockSpec((1, H), lambda i: (0, 0)),
            pl.BlockSpec((1, H), lambda i: (0, 0)),
        ],
        out_specs=pl.BlockSpec((tm, H), lambda i: (i, 0)),
        compiler_params=pltpu.CompilerParams(dimension_semantics=("parallel",)),
    )(x.astype(F32), gamma2, beta2)


def _attn_block_kernel(x_ref, mask_ref, wqkv_ref, bqkv_ref, wo_ref, bo_ref,
                       g_ref, beta_ref, o_ref, *, num_heads, eps):
    """Fused: QKV proj -> per-head SDPA -> out proj -> residual -> LayerNorm."""
    x = x_ref[0]                                     # (S, H) f32
    S, H = x.shape
    hd = H // num_heads
    scale = 1.0 / math.sqrt(hd)

    # single fused QKV matmul on bf16 operands, f32 accumulation
    qkv = jnp.dot(x.astype(BF16), wqkv_ref[...],
                  preferred_element_type=jnp.float32) + bqkv_ref[...]   # (S, 3H)

    # additive key mask, applied in f32 after the dot
    bias = (1.0 - mask_ref[0]) * jnp.float32(-1e9)   # (1, S)

    ctx_heads = []
    for h in range(num_heads):                       # static unrolled head loop
        qh = qkv[:, h * hd:(h + 1) * hd]
        kh = qkv[:, H + h * hd:H + (h + 1) * hd]
        vh = qkv[:, 2 * H + h * hd:2 * H + (h + 1) * hd]
        s = jnp.einsum('qd,kd->qk', qh.astype(BF16), kh.astype(BF16),
                       preferred_element_type=jnp.float32) * scale + bias
        s = s - jnp.max(s, axis=-1, keepdims=True)
        p = jnp.exp(s)
        p = p * pl.reciprocal(jnp.sum(p, axis=-1, keepdims=True), approx=True)
        ctx_heads.append(jnp.dot(p.astype(BF16), vh.astype(BF16),
                                 preferred_element_type=jnp.float32))
    ctx = jnp.concatenate(ctx_heads, axis=-1)        # (S, H)

    attn_out = jnp.dot(ctx.astype(BF16), wo_ref[...],
                       preferred_element_type=jnp.float32) + bo_ref[...]
    y = attn_out + x                                 # residual, f32
    mean = jnp.mean(y, axis=-1, keepdims=True)
    yc = y - mean
    var = jnp.mean(yc * yc, axis=-1, keepdims=True)
    o_ref[0] = yc * jax.lax.rsqrt(var + eps) * g_ref[...] + beta_ref[...]


def pallas_attention_block(x, mask3, layer, *, num_heads, eps=1e-7):
    """x: (B, S, H) f32; mask3: (B, 1, S) f32."""
    B, S, H = x.shape
    return pl.pallas_call(
        functools.partial(_attn_block_kernel, num_heads=num_heads, eps=eps),
        out_shape=jax.ShapeDtypeStruct((B, S, H), F32),
        grid=(B,),
        in_specs=[
            pl.BlockSpec((1, S, H), lambda b: (b, 0, 0)),
            pl.BlockSpec((1, 1, S), lambda b: (b, 0, 0)),
            pl.BlockSpec((H, 3 * H), lambda b: (0, 0)),
            pl.BlockSpec((1, 3 * H), lambda b: (0, 0)),
            pl.BlockSpec((H, H), lambda b: (0, 0)),
            pl.BlockSpec((1, H), lambda b: (0, 0)),
            pl.BlockSpec((1, H), lambda b: (0, 0)),
            pl.BlockSpec((1, H), lambda b: (0, 0)),
        ],
        out_specs=pl.BlockSpec((1, S, H), lambda b: (b, 0, 0)),
        compiler_params=pltpu.CompilerParams(dimension_semantics=("parallel",)),
    )(x, mask3, layer["wqkv"], layer["bqkv"], layer["wo"], layer["bo"],
      layer["ln1_g"], layer["ln1_b"])


def _ffn_block_kernel(x_ref, w1_ref, b1_ref, w2_ref, b2_ref, g_ref, beta_ref,
                      o_ref, *, eps):
    """Fused: w1 matmul + GELU + w2 matmul + residual + LayerNorm."""
    x = x_ref[...]                                   # (tm, H) f32
    h = jnp.dot(x.astype(BF16), w1_ref[...],
                preferred_element_type=jnp.float32) + b1_ref[...]
    # TODO(synk): HF DeBERTa uses exact erf GELU; tanh approximation used here.
    h = jax.nn.gelu(h, approximate=True)
    y = jnp.dot(h.astype(BF16), w2_ref[...],
                preferred_element_type=jnp.float32) + b2_ref[...]
    y = y + x                                        # residual, f32
    mean = jnp.mean(y, axis=-1, keepdims=True)
    yc = y - mean
    var = jnp.mean(yc * yc, axis=-1, keepdims=True)
    o_ref[...] = yc * jax.lax.rsqrt(var + eps) * g_ref[...] + beta_ref[...]


def pallas_ffn_block(x, layer, *, eps=1e-7):
    """x: (M, H) f32."""
    M, H = x.shape
    I = layer["w1"].shape[1]
    tm = _row_tile(M)
    return pl.pallas_call(
        functools.partial(_ffn_block_kernel, eps=eps),
        out_shape=jax.ShapeDtypeStruct((M, H), F32),
        grid=(pl.cdiv(M, tm),),
        in_specs=[
            pl.BlockSpec((tm, H), lambda i: (i, 0)),
            pl.BlockSpec((H, I), lambda i: (0, 0)),
            pl.BlockSpec((1, I), lambda i: (0, 0)),
            pl.BlockSpec((I, H), lambda i: (0, 0)),
            pl.BlockSpec((1, H), lambda i: (0, 0)),
            pl.BlockSpec((1, H), lambda i: (0, 0)),
            pl.BlockSpec((1, H), lambda i: (0, 0)),
        ],
        out_specs=pl.BlockSpec((tm, H), lambda i: (i, 0)),
        compiler_params=pltpu.CompilerParams(dimension_semantics=("parallel",)),
    )(x, layer["w1"], layer["b1"], layer["w2"], layer["b2"],
      layer["ln2_g"], layer["ln2_b"])


def _lm_head_kernel(x_ref, w_ref, b_ref, o_ref):
    o_ref[...] = jnp.dot(x_ref[...].astype(BF16), w_ref[...],
                         preferred_element_type=jnp.float32) + b_ref[...]


def pallas_lm_head(x, w, b2):
    """Tiled (M,H) @ (H,V) + b. Gridded over (row tiles, vocab tiles)."""
    M, H = x.shape
    V = w.shape[1]
    tm = _row_tile(M)
    tn = _col_tile(V)
    # K (=H) is kept whole per tile; at real DeBERTa sizes (H<=1536) an
    # (H, tn) bf16 weight tile stays well within even v7x's 64 MiB VMEM.
    return pl.pallas_call(
        _lm_head_kernel,
        out_shape=jax.ShapeDtypeStruct((M, V), F32),
        grid=(pl.cdiv(M, tm), pl.cdiv(V, tn)),
        in_specs=[
            pl.BlockSpec((tm, H), lambda i, j: (i, 0)),
            pl.BlockSpec((H, tn), lambda i, j: (0, j)),
            pl.BlockSpec((1, tn), lambda i, j: (0, j)),
        ],
        out_specs=pl.BlockSpec((tm, tn), lambda i, j: (i, j)),
        compiler_params=pltpu.CompilerParams(
            dimension_semantics=("parallel", "parallel")),
    )(x, w, b2)


def _cls_loss_kernel(labels_ref, pooled_ref, w_ref, b_ref,
                     logits_ref, loss_ref, *, num_labels, batch):
    """Classification head (lane-padded to 128) + mean CrossEntropyLoss."""
    logits = jnp.dot(pooled_ref[...].astype(BF16), w_ref[...],
                     preferred_element_type=jnp.float32) + b_ref[...]  # (B, Lp)
    B, Lp = logits.shape
    col = jax.lax.broadcasted_iota(jnp.int32, (B, Lp), 1)
    row = jax.lax.broadcasted_iota(jnp.int32, (B, Lp), 0)
    valid = col < num_labels
    masked = jnp.where(valid, logits, jnp.float32(-1e30))
    m = jnp.max(masked, axis=-1, keepdims=True)
    expv = jnp.where(valid, jnp.exp(masked - m), 0.0)
    lse = jnp.log(jnp.sum(expv, axis=-1, keepdims=True)) + m           # (B, 1)

    onehot = jnp.zeros((B, Lp), jnp.float32)
    for i in range(batch):                           # labels read from SMEM
        lbl = labels_ref[i]
        onehot = onehot + jnp.where(
            jnp.logical_and(row == i, col == lbl), 1.0, 0.0)
    true_logit = jnp.sum(logits * onehot, axis=-1, keepdims=True)      # (B, 1)

    logits_ref[...] = logits
    loss_ref[...] = jnp.sum(lse - true_logit, axis=0, keepdims=True) / batch


def pallas_cls_head_and_loss(pooled, w_pad, b_pad2, labels, num_labels):
    """pooled: (B, H); w_pad: (H, NLpad) bf16; labels: (B,) int32 in SMEM."""
    B, H = pooled.shape
    NLpad = w_pad.shape[1]
    grid_spec = pltpu.PrefetchScalarGridSpec(
        num_scalar_prefetch=1,
        grid=(1,),
        in_specs=[
            pl.BlockSpec((B, H), lambda i, lab: (0, 0)),
            pl.BlockSpec((H, NLpad), lambda i, lab: (0, 0)),
            pl.BlockSpec((1, NLpad), lambda i, lab: (0, 0)),
        ],
        out_specs=[
            pl.BlockSpec((B, NLpad), lambda i, lab: (0, 0)),
            pl.BlockSpec((1, 1), lambda i, lab: (0, 0)),
        ],
    )
    logits_pad, loss = pl.pallas_call(
        functools.partial(_cls_loss_kernel, num_labels=num_labels, batch=B),
        grid_spec=grid_spec,
        out_shape=(jax.ShapeDtypeStruct((B, NLpad), F32),
                   jax.ShapeDtypeStruct((1, 1), F32)),
    )(labels, pooled, w_pad, b_pad2)
    return logits_pad[:, :num_labels], loss[0, 0]


# ----------------------------- Model definition -------------------------------

def init_params(key, cfg):
    H = cfg["hidden_size"]
    I = cfg["intermediate_size"]
    V = cfg["vocab_size"]
    P = cfg["max_position"]
    L = cfg["num_layers"]
    NL = cfg["num_labels"]
    NLpad = max(128, ((NL + 127) // 128) * 128)
    cfg["num_labels_pad"] = NLpad

    keys = iter(jax.random.split(key, 4 + 4 * L))

    def dense(k, shape, dtype=BF16):
        return (0.02 * jax.random.normal(k, shape, dtype=jnp.float32)).astype(dtype)

    cls_core = 0.02 * jax.random.normal(next(keys), (H, NL), dtype=jnp.float32)
    cls_w = jnp.zeros((H, NLpad), F32).at[:, :NL].set(cls_core).astype(BF16)

    params = {
        "word_emb": dense(next(keys), (V, H), F32),
        "pos_emb": dense(next(keys), (P, H), F32),
        "emb_ln_g": jnp.ones((1, H), F32),
        "emb_ln_b": jnp.zeros((1, H), F32),
        "layers": [],
        "cls_w": cls_w,
        "cls_b": jnp.zeros((1, NLpad), F32),
        "lm_w": dense(next(keys), (H, V), BF16),
        "lm_b": jnp.zeros((1, V), F32),
    }
    for _ in range(L):
        params["layers"].append({
            "wqkv": dense(next(keys), (H, 3 * H), BF16),
            "bqkv": jnp.zeros((1, 3 * H), F32),
            "wo": dense(next(keys), (H, H), BF16),
            "bo": jnp.zeros((1, H), F32),
            "ln1_g": jnp.ones((1, H), F32), "ln1_b": jnp.zeros((1, H), F32),
            "w1": dense(next(keys), (H, I), BF16),
            "b1": jnp.zeros((1, I), F32),
            "w2": dense(next(keys), (I, H), BF16),
            "b2": jnp.zeros((1, H), F32),
            "ln2_g": jnp.ones((1, H), F32), "ln2_b": jnp.zeros((1, H), F32),
        })
    return params


def deberta_multitask_forward(params, cfg, input_ids, attention_mask,
                              classification_labels=None):
    """Mirrors DebertaForMultiTask.forward (generation_labels forced to None)."""
    B, S = input_ids.shape
    H = cfg["hidden_size"]
    nh = cfg["num_heads"]
    V = cfg["vocab_size"]
    NL = cfg["num_labels"]
    M = B * S

    # ---- embeddings (word + position, then LayerNorm) ----
    word = params["word_emb"][input_ids]                       # (B, S, H)
    pos = params["pos_emb"][:S][None, :, :]                    # (1, S, H)
    emb = (word + pos).reshape(M, H).astype(F32)
    emb = pallas_layernorm(emb, params["emb_ln_g"], params["emb_ln_b"])
    grad_hidden_states = emb.reshape(B, S, H)                  # hidden_states[0]

    # per-batch key mask (no B*num_heads duplication)
    mask3 = attention_mask.astype(F32).reshape(B, 1, S)

    x = emb.reshape(B, S, H)
    for layer in params["layers"]:
        x = pallas_attention_block(x, mask3, layer, num_heads=nh)
        x = pallas_ffn_block(x.reshape(M, H), layer).reshape(B, S, H)

    last_hidden_state = x                                       # (B, S, H)
    pooled_output = last_hidden_state[:, 0, :]                  # (B, H)

    labels = (classification_labels.astype(jnp.int32)
              if classification_labels is not None
              else jnp.zeros((B,), jnp.int32))
    classification_logits, ce = pallas_cls_head_and_loss(
        pooled_output, params["cls_w"], params["cls_b"], labels, NL)

    lm_logits = pallas_lm_head(last_hidden_state.reshape(M, H),
                               params["lm_w"], params["lm_b"]).reshape(B, S, V)

    loss = jnp.float32(0.0)
    classification_loss = jnp.float32(0.0)
    generation_loss = jnp.float32(0.0)   # module sets generation_labels = None
    if classification_labels is not None:
        classification_loss = ce
        loss = loss + classification_loss

    return (loss, classification_logits, lm_logits, classification_loss,
            generation_loss, grad_hidden_states)


# ----------------------------------- main -------------------------------------

if __name__ == "__main__":
    cfg = dict(vocab_size=128, hidden_size=32, num_heads=4, num_layers=2,
               intermediate_size=64, max_position=16, num_labels=3)

    key = jax.random.PRNGKey(0)
    pkey, ikey, lkey = jax.random.split(key, 3)

    params = init_params(pkey, cfg)

    B, S = 2, 8
    input_ids = jax.random.randint(ikey, (B, S), 0, cfg["vocab_size"],
                                   dtype=jnp.int32)
    attention_mask = jnp.ones((B, S), dtype=jnp.int32).at[1, 6:].set(0)
    classification_labels = jax.random.randint(lkey, (B,), 0, cfg["num_labels"],
                                               dtype=jnp.int32)

    outs = deberta_multitask_forward(params, cfg, input_ids, attention_mask,
                                     classification_labels)
    jax.block_until_ready(outs)

    loss, cls_logits, lm_logits, cls_loss, gen_loss, grad_hs = outs
    assert cls_logits.shape == (B, cfg["num_labels"])
    assert lm_logits.shape == (B, S, cfg["vocab_size"])
    assert grad_hs.shape == (B, S, cfg["hidden_size"])
    assert jnp.isfinite(loss)
    print("KERNEL_OK")
</pallas_src>

<mosaic_0001>
module attributes {stable_mosaic.version = 11 : i64} {
  func.func @_layernorm_kernel(%arg0: i32, %arg1: memref<16x32xf32, #tpu.memory_space<vmem>>, %arg2: memref<1x32xf32, #tpu.memory_space<vmem>>, %arg3: memref<1x32xf32, #tpu.memory_space<vmem>>, %arg4: memref<16x32xf32, #tpu.memory_space<vmem>>) attributes {dimension_semantics = [#tpu.dimension_semantics<parallel>], iteration_bounds = array<i64: 1>, scalar_prefetch = 0 : i64, scratch_operands = 0 : i64, tpu.core_type = #tpu.core_type<tc>, window_params = [{transform_indices = @transform_0, window_bounds = array<i64: 16, 32>}, {pipeline_mode = #tpu.pipeline_mode<synchronous>, transform_indices = @transform_1, window_bounds = array<i64: 1, 32>}, {pipeline_mode = #tpu.pipeline_mode<synchronous>, transform_indices = @transform_2, window_bounds = array<i64: 1, 32>}, {transform_indices = @transform_3, window_bounds = array<i64: 16, 32>}]} {
    %c0 = arith.constant 0 : index
    %c0_0 = arith.constant 0 : index
    %0 = vector.load %arg1[%c0, %c0_0] : memref<16x32xf32, #tpu.memory_space<vmem>>, vector<16x32xf32>
    %cst = arith.constant dense<0.000000e+00> : vector<16xf32>
    %1 = vector.multi_reduction <add>, %0, %cst [1] : vector<16x32xf32> to vector<16xf32>
    %2 = vector.shape_cast %1 : vector<16xf32> to vector<16x1xf32>
    %cst_1 = arith.constant 3.200000e+01 : f32
    %3 = vector.broadcast %cst_1 : f32 to vector<16x1xf32>
    %4 = arith.divf %2, %3 : vector<16x1xf32>
    %5 = vector.broadcast %4 : vector<16x1xf32> to vector<16x32xf32>
    %6 = arith.subf %0, %5 : vector<16x32xf32>
    %7 = arith.mulf %6, %6 : vector<16x32xf32>
    %cst_2 = arith.constant dense<0.000000e+00> : vector<16xf32>
    %8 = vector.multi_reduction <add>, %7, %cst_2 [1] : vector<16x32xf32> to vector<16xf32>
    %9 = vector.shape_cast %8 : vector<16xf32> to vector<16x1xf32>
    %cst_3 = arith.constant 3.200000e+01 : f32
    %10 = vector.broadcast %cst_3 : f32 to vector<16x1xf32>
    %11 = arith.divf %9, %10 : vector<16x1xf32>
    %cst_4 = arith.constant 1.000000e-07 : f32
    %12 = vector.broadcast %cst_4 : f32 to vector<16x1xf32>
    %13 = arith.addf %11, %12 : vector<16x1xf32>
    %14 = math.rsqrt %13 : vector<16x1xf32>
    %15 = vector.broadcast %14 : vector<16x1xf32> to vector<16x32xf32>
    %16 = arith.mulf %6, %15 : vector<16x32xf32>
    %c0_5 = arith.constant 0 : index
    %c0_6 = arith.constant 0 : index
    %17 = vector.load %arg2[%c0_5, %c0_6] : memref<1x32xf32, #tpu.memory_space<vmem>>, vector<1x32xf32>
    %18 = vector.broadcast %17 : vector<1x32xf32> to vector<16x32xf32>
    %19 = arith.mulf %16, %18 : vector<16x32xf32>
    %c0_7 = arith.constant 0 : index
    %c0_8 = arith.constant 0 : index
    %20 = vector.load %arg3[%c0_7, %c0_8] : memref<1x32xf32, #tpu.memory_space<vmem>>, vector<1x32xf32>
    %21 = vector.broadcast %20 : vector<1x32xf32> to vector<16x32xf32>
    %22 = arith.addf %19, %21 : vector<16x32xf32>
    %c0_9 = arith.constant 0 : index
    %c0_10 = arith.constant 0 : index
    %23 = vector.load %arg4[%c0_9, %c0_10] : memref<16x32xf32, #tpu.memory_space<vmem>>, vector<16x32xf32>
    tpu.vector_store %arg4[%c0_9, %c0_10], %22 {strides = array<i32>} : memref<16x32xf32, #tpu.memory_space<vmem>>, vector<16x32xf32>,
    return
  }
  func.func @transform_0(%arg0: i32) -> (i32, i32) {
    %c0_i32 = arith.constant 0 : i32
    %c0_i32_0 = arith.constant 0 : i32
    return %arg0, %c0_i32 : i32, i32
  }
  func.func @transform_1(%arg0: i32) -> (i32, i32) {
    %c0_i32 = arith.constant 0 : i32
    %c0_i32_0 = arith.constant 0 : i32
    %c0_i32_1 = arith.constant 0 : i32
    return %c0_i32, %c0_i32_0 : i32, i32
  }
  func.func @transform_2(%arg0: i32) -> (i32, i32) {
    %c0_i32 = arith.constant 0 : i32
    %c0_i32_0 = arith.constant 0 : i32
    %c0_i32_1 = arith.constant 0 : i32
    return %c0_i32, %c0_i32_0 : i32, i32
  }
  func.func @transform_3(%arg0: i32) -> (i32, i32) {
    %c0_i32 = arith.constant 0 : i32
    %c0_i32_0 = arith.constant 0 : i32
    return %arg0, %c0_i32 : i32, i32
  }
}

</mosaic_0001>

<bundles_post_ra>
// kernel: tpu_custom_call.1
= control target key start
LH: loop header
LB: loop body
LE: loop exit
PB: predicated region body
PF: predicated region fallthrough
CT: control target
= control target key end

     0   :  { %8 = vsyncpa [#allocation3], 0  ;;  %s275_s0 = inlined_call_operand.hbm [shape: f32[16,32], index: 0, kind: input, shape index: {}]   ;;  %s276_s1 = inlined_call_operand.hbm [shape: f32[1,32], index: 1, kind: input, shape index: {}]   ;;  %s277_s2 = inlined_call_operand.vmem [shape: f32[1,32], index: 2, kind: input, shape index: {}]   ;;  %s278_s3 = inlined_call_operand.hbm [shape: f32[16,32], index: 3, kind: output, shape index: {}]  }
   0x1   :  { %9 = vsyncpa [#allocation6], 0 }
   0x2   :  { %10 = vsyncpa [#allocation4], 0  ;;  %s15_s14 = sshll.u32 %s275_s0, 4  ;;  %s225_s15 = smov [#allocation2]   ;;  %s16_s14 = int_to_ptr.hbm [resolvable:$true] %s15_s14 }
   0x3   :  { %s17_s16 = sshll.u32 %s225_s15, 4  ;;  %s29_s19 = sshll.u32 %s276_s1, 4  ;;  %s18_s16 = int_to_ptr.vmem [resolvable:$true] %s17_s16  ;;  %s30_s19 = int_to_ptr.hbm [resolvable:$true] %s29_s19 }
   0x4   :  { %s226_s20 = smov 128   ;;  %s227_s21 = smov 8  }
   0x5   :  { %23 = dma.hbm_to_vmem [thread:$0]  %s16_s14, 256, %s18_s16, [#allocation3], %s226_s20, %s226_s20, %s227_s21  }
   0x6   :  { %s228_s22 = smov [#allocation5]  }
   0x7   :  { %s31_s23 = sshll.u32 %s228_s22, 4  ;;  %s32_s23 = int_to_ptr.vmem [resolvable:$true] %s31_s23 }
   0x8   :  { %34 = dma.hbm_to_vmem [thread:$0]  %s30_s19, 16, %s32_s23, [#allocation6]  }
   0x9   :  { %219 = dma.done.wait [#allocation3], 256  }
   0xa   :  { %220 = vsyncadd [#allocation3], 4294967040 }
   0xb   :  { %221 = dma.done.wait [#allocation6], 16  }
   0xc   :  { %222 = vsyncadd [#allocation6], 4294967280  ;;  %vm47_vm0 = vcmask 261120   ;;  %v45_v0 = vld [vmem:[#allocation2] sm:$0xff]  ;;  %v46_v2 = vld [vmem:[#allocation2 + $0x8] sm:$0xff]  ;;  %v229_v4 = vmov 32.0  }
   0xd   :  { %v48_v1 = vsel %vm47_vm0, %v45_v0, 0.0  ;;  %v51_v3 = vsel %vm47_vm0, %v46_v2, 0.0  ;;  %141 = vrcp.f32 %v229_v4  ;;  %v139_v35 = vld [vmem:[#allocation5] ss:$0 sm:$0xff]  ;;  %v140_v39 = vld [vmem:[%s277_s2] ss:$0 sm:$0xff] }
   0xe   :  { %49 = vadd.xlane.f32.xlu0 %v48_v1  ;;  %s230_s24 = smov [#allocation7]   ;;  %s119_s28 = sshll.u32 %s278_s3, 4  ;;  %s120_s28 = int_to_ptr.hbm [resolvable:$true] %s119_s28 }
   0xf   :  { %s117_s25 = sshll.u32 %s230_s24, 4  ;;  %s118_s25 = int_to_ptr.vmem [resolvable:$true] %s117_s25 }
  0x13   :  { %v142_v5 = vpop.eup %141 }
  0x14   :  { %v55_v6 = vmul.f32 32.0, %v142_v5  ;;  %vm59_vm1 = vweird.f32 %v142_v5 }
  0x16   :  { %52 = vadd.xlane.f32.xlu0 %v51_v3  ;;  %v56_v7 = vsub.f32 1.0, %v55_v6 }
  0x18   :  { %v57_v8 = vmul.f32 %v142_v5, %v56_v7 }
  0x1a   :  { %v58_v9 = vadd.f32 %v142_v5, %v57_v8 }
  0x1c   :  { %v60_v10 = vsel %vm59_vm1, %v142_v5, %v58_v9 }
  0x81   :  { %v50_v11 = vpop.xlane.xlu0 %49 }
  0x82   :  { %v61_v12 = vmul.f32 %v60_v10, %v50_v11 }
  0x84   :  { %v63_v13 = vsub.f32 %v45_v0, %v61_v12 }
  0x86   :  { %v65_v14 = vmul.f32 %v63_v13, %v63_v13 }
  0x88   :  { %v67_v15 = vsel %vm47_vm0, %v65_v14, 0.0 }
  0x89   :  { %68 = vadd.xlane.f32.xlu1 %v67_v15  ;;  %v53_v16 = vpop.xlane.xlu0 %52 }
  0x8a   :  { %v62_v17 = vmul.f32 %v60_v10, %v53_v16 }
  0x8c   :  { %v64_v18 = vsub.f32 %v46_v2, %v62_v17 }
  0x8e   :  { %v66_v19 = vmul.f32 %v64_v18, %v64_v18 }
  0x90   :  { %v70_v20 = vsel %vm47_vm0, %v66_v19, 0.0 }
  0x91   :  { %71 = vadd.xlane.f32.xlu1 %v70_v20 }
  0xfc   :  { %v69_v21 = vpop.xlane.xlu1 %68 }
  0xfd   :  { %v73_v22 = vmul.f32 %v69_v21, %v60_v10 }
  0xff   :  { %v75_v23 = vadd.f32 1e-07, %v73_v22 }
 0x101   :  { %143 = vrsqrt.f32 %v75_v23  ;;  %vm83_vm3 = vweird.f32 %v75_v23 }
 0x104   :  { %v72_v24 = vpop.xlane.xlu1 %71 }
 0x105   :  { %v74_v25 = vmul.f32 %v72_v24, %v60_v10 }
 0x107   :  { %v144_v26 = vpop.eup %143  ;;  %v76_v27 = vadd.f32 1e-07, %v74_v25 }
 0x108   :  { %v78_v28 = vmul.f32 %v144_v26, %v75_v23  ;;  %vm84_vm2 = vweird.f32 %v144_v26 }
 0x109   :  { %145 = vrsqrt.f32 %v76_v27  ;;  %vm85_vm4 = vmor %vm83_vm3, %vm84_vm2  ;;  %vm93_vm6 = vweird.f32 %v76_v27 }
 0x10a   :  { %v79_v29 = vmul.f32 %v144_v26, %v78_v28 }
 0x10c   :  { %v80_v30 = vmul.f32 0.5, %v79_v29 }
 0x10e   :  { %v81_v31 = vsub.f32 1.5, %v80_v30 }
 0x10f   :  { %v146_v32 = vpop.eup %145 }
 0x110   :  { %v82_v33 = vmul.f32 %v144_v26, %v81_v31  ;;  %v88_v34 = vmul.f32 %v146_v32, %v76_v27  ;;  %vm94_vm5 = vweird.f32 %v146_v32 }
 0x111   :  { %vm95_vm7 = vmor %vm93_vm6, %vm94_vm5 }
 0x112   :  { %v86_v36 = vsel %vm85_vm4, %v144_v26, %v82_v33  ;;  %v89_v37 = vmul.f32 %v146_v32, %v88_v34 }
 0x113   :  { %v97_v38 = vmul.f32 %v86_v36, %v63_v13 }
 0x114   :  { %v90_v40 = vmul.f32 0.5, %v89_v37 }
 0x115   :  { %v103_v41 = vmul.f32 %v139_v35, %v97_v38 }
 0x116   :  { %v91_v42 = vsub.f32 1.5, %v90_v40 }
 0x117   :  { %v109_v43 = vadd.f32 %v140_v39, %v103_v41 }
 0x118   :  { %v92_v44 = vmul.f32 %v146_v32, %v91_v42 }
 0x119   :  { %111 = vst.msk [vmem:[#allocation7] sm:$0xff] %vm47_vm0, %v109_v43 }
 0x11a   :  { %v96_v45 = vsel %vm95_vm7, %v146_v32, %v92_v44 }
 0x11b   :  { %v98_v46 = vmul.f32 %v96_v45, %v64_v18 }
 0x11d   :  { %v104_v47 = vmul.f32 %v139_v35, %v98_v46 }
 0x11f   :  { %v110_v48 = vadd.f32 %v140_v39, %v104_v47 }
 0x121   :  { %112 = vst.msk [vmem:[#allocation7 + $0x8] sm:$0xff] %vm47_vm0, %v110_v48 }
 0x122   :  { %125 = dma.vmem_to_hbm [thread:$0]  %s118_s25, 256, %s120_s28, [#allocation4], %s226_s20, %s226_s20, %s227_s21  }
 0x123   :  { %223 = dma.done.wait [#allocation4], 256  }
 0x124   :  { %224 = vsyncadd [#allocation4], 4294967040 }
 0x125   :  { %130 = vsyncpa [#allocation3], 1 }
 0x126   :  { %131 = vsyncpa [#allocation6], 1 }
 0x127   :  { %132 = vsyncpa [#allocation4], 1 }

</bundles_post_ra>
